<compile_context>
chip_gen: v7x
topology: tpu7x:2x2x1
jax: 0.10.0
libtpu: 0.0.40
codegen_flags: <defaults>
</compile_context>

<pallas_src>
import functools
import math

import jax
import jax.numpy as jnp
from jax.experimental import pallas as pl
from jax.experimental.pallas import tpu as pltpu

_LANE = 128
_SUBLANE = 8
# Pure HBM-streaming kernel: large blocks amortize per-step overhead.
# in + out are each double-buffered -> scoped VMEM ~= 4x block bytes.
_MAX_BLOCK_BYTES = 8 * 1024 * 1024
_VMEM_LIMIT_BYTES = 48 * 1024 * 1024  # headroom under 64 MiB physical on v7x


def _drop_path_kernel(keep_ref, x_ref, o_ref, *, inv_keep_prob):
    """One grid step = one lane-dense chunk of one batch sample.

    keep_ref   : SMEM scalar-prefetch ref, shape (B,), int32 (1 = keep, 0 = drop)
    x_ref/o_ref: VMEM tiles (1, S, 128)
    """
    b = pl.program_id(0)
    keep = keep_ref[b]

    @pl.when(keep != 0)
    def _():
        # Native-dtype multiply (bf16 stays bf16 on v6e/v7x VPUs); weak-typed
        # python float keeps f32 inputs in f32.
        o_ref[...] = (x_ref[...] * inv_keep_prob).astype(o_ref.dtype)

    @pl.when(keep == 0)
    def _():
        # Dropped sample: never read x (its fetches are deduped away by the
        # pinned input index_map), just write zeros.
        o_ref[...] = jnp.zeros_like(o_ref)


def drop_path(x, drop_prob: float = 0.0, training: bool = False, seed: int = 0):
    """JAX/Pallas equivalent of the PyTorch drop_path()."""
    if drop_prob == 0.0 or not training:
        return x
    if drop_prob >= 1.0:
        # PyTorch would produce NaN (x / 0 * 0); every sample is dropped.
        return jnp.zeros_like(x)
    keep_prob = 1.0 - drop_prob
    inv_keep_prob = 1.0 / keep_prob

    B = x.shape[0]
    F = math.prod(x.shape[1:])
    itemsize = jnp.dtype(x.dtype).itemsize

    # Per-sample keep flags, same math as torch: floor(keep_prob + U[0,1)).
    # The mask depends only on the batch index, so chunking a sample is safe.
    u = jax.random.uniform(jax.random.PRNGKey(seed), (B,), dtype=jnp.float32)
    keep = jnp.floor(keep_prob + u).astype(jnp.int32)  # (B,) of 0 / 1

    # Lane-dense (B, R, 128) layout.  Only pad F up to a multiple of 128; the
    # sublane remainder is absorbed by the ragged last block (cdiv grid), so
    # most shapes (F % 128 == 0) need no wrapper-side pad / slice copies.
    F_pad = ((F + _LANE - 1) // _LANE) * _LANE
    x2 = x.reshape(B, F)
    if F_pad != F:
        x2 = jnp.pad(x2, ((0, 0), (0, F_pad - F)))
    R = F_pad // _LANE
    x3 = x2.reshape(B, R, _LANE)

    # Sublane chunk S: either the full sample (block dim == array dim is always
    # legal) or a large multiple of 8 capped by the per-block byte budget, with
    # a ragged last block — no divisor search, no S=8 cliff.
    cap_rows = max(_SUBLANE, _MAX_BLOCK_BYTES // (_LANE * itemsize))
    cap_rows -= cap_rows % _SUBLANE
    S = R if R <= cap_rows else cap_rows
    grid = (B, pl.cdiv(R, S))
    block = (1, S, _LANE)

    def in_idx(b, c, keep_ref):
        # Dropped samples pin every chunk to block 0: Pallas skips the
        # repeated (identical) input fetch, saving ~drop_prob of HBM reads.
        return (b, jnp.where(keep_ref[b] != 0, c, 0), 0)

    def out_idx(b, c, keep_ref):  # scalar-prefetch ref is positional trailing arg
        return (b, c, 0)

    out = pl.pallas_call(
        functools.partial(_drop_path_kernel, inv_keep_prob=inv_keep_prob),
        out_shape=jax.ShapeDtypeStruct((B, R, _LANE), x.dtype),
        grid_spec=pltpu.PrefetchScalarGridSpec(
            num_scalar_prefetch=1,
            grid=grid,
            in_specs=[pl.BlockSpec(block, in_idx)],
            out_specs=pl.BlockSpec(block, out_idx),
        ),
        compiler_params=pltpu.CompilerParams(
            dimension_semantics=("parallel", "parallel"),
            vmem_limit_bytes=_VMEM_LIMIT_BYTES,
        ),
        cost_estimate=pl.CostEstimate(
            flops=B * F_pad,
            transcendentals=0,
            bytes_accessed=2 * B * F_pad * itemsize,
        ),
    )(keep, x3)

    out = out.reshape(B, F_pad)
    if F_pad != F:
        out = out[:, :F]
    return out.reshape(x.shape)


class DropPath:
    """Drop paths (Stochastic Depth) per sample."""

    def __init__(self, drop_prob=None):
        self.drop_prob = drop_prob if drop_prob is not None else 0.0
        self.training = True

    def __call__(self, x, seed: int = 0):
        return drop_path(x, self.drop_prob, self.training, seed=seed)


if __name__ == "__main__":
    key = jax.random.PRNGKey(0)
    x = jax.random.normal(key, (2, 4, 16, 16), dtype=jnp.float32)

    # --- Training mode with nonzero drop_prob -> kernel path. ---
    module = DropPath(drop_prob=0.5)
    y = jax.block_until_ready(module(x, seed=1234))

    # Sanity: each sample must be either all-zero or exactly x / keep_prob.
    keep_prob = 1.0 - 0.5
    for b in range(x.shape[0]):
        yb = y[b]
        xb = x[b] / keep_prob
        is_zero = bool(jnp.all(yb == 0.0))
        is_scaled = bool(jnp.allclose(yb, xb, atol=1e-5, rtol=1e-5))
        assert is_zero or is_scaled, f"sample {b} mask not 0/1"

    # --- Odd shape (F not a multiple of 128) exercises the pad/ragged path. ---
    x_odd = jax.random.normal(jax.random.PRNGKey(1), (2, 3, 5, 7), dtype=jnp.float32)
    y_odd = jax.block_until_ready(drop_path(x_odd, 0.3, True, seed=7))
    u_ref = jax.random.uniform(jax.random.PRNGKey(7), (2,), dtype=jnp.float32)
    mask_ref = jnp.floor(0.7 + u_ref).reshape(2, 1, 1, 1)
    ref = x_odd / 0.7 * mask_ref
    assert bool(jnp.allclose(y_odd, ref, atol=1e-5, rtol=1e-5)), "odd-shape mismatch"

    # --- Eval mode (or drop_prob == 0) -> identity, matching PyTorch semantics. ---
    module.training = False
    y_eval = jax.block_until_ready(module(x))
    assert bool(jnp.array_equal(y_eval, x))

    print("KERNEL_OK")
</pallas_src>

<mosaic_0001>
module attributes {stable_mosaic.version = 11 : i64} {
  func.func @_drop_path_kernel(%arg0: i32, %arg1: i32, %arg2: memref<2xi32, #tpu.memory_space<smem>>, %arg3: memref<1x8x128xf32, #tpu.memory_space<vmem>>, %arg4: memref<1x8x128xf32, #tpu.memory_space<vmem>>) attributes {dimension_semantics = [#tpu.dimension_semantics<parallel>, #tpu.dimension_semantics<parallel>], iteration_bounds = array<i64: 2, 1>, scalar_prefetch = 1 : i64, scratch_operands = 0 : i64, tpu.core_type = #tpu.core_type<tc>, window_params = [{transform_indices = @transform_0, window_bounds = array<i64: 1, 8, 128>}, {transform_indices = @transform_1, window_bounds = array<i64: 1, 8, 128>}]} {
    %0 = arith.index_cast %arg0 : i32 to index
    %1 = memref.load %arg2[%0] : memref<2xi32, #tpu.memory_space<smem>>
    %c0_i32 = arith.constant 0 : i32
    %2 = arith.cmpi ne, %1, %c0_i32 : i32
    %3 = arith.extui %2 : i1 to i32
    %c0_i32_0 = arith.constant 0 : i32
    %4 = arith.cmpi ne, %3, %c0_i32_0 : i32
    scf.if %4 {
      %c0 = arith.constant 0 : index
      %c0_3 = arith.constant 0 : index
      %c0_4 = arith.constant 0 : index
      %8 = vector.load %arg3[%c0, %c0_3, %c0_4] : memref<1x8x128xf32, #tpu.memory_space<vmem>>, vector<1x8x128xf32>
      %cst = arith.constant 2.000000e+00 : f32
      %9 = vector.broadcast %cst : f32 to vector<1x8x128xf32>
      %10 = arith.mulf %8, %9 : vector<1x8x128xf32>
      %c0_5 = arith.constant 0 : index
      %c0_6 = arith.constant 0 : index
      %c0_7 = arith.constant 0 : index
      %11 = vector.load %arg4[%c0_5, %c0_6, %c0_7] : memref<1x8x128xf32, #tpu.memory_space<vmem>>, vector<1x8x128xf32>
      tpu.vector_store %arg4[%c0_5, %c0_6, %c0_7], %10 {strides = array<i32>} : memref<1x8x128xf32, #tpu.memory_space<vmem>>, vector<1x8x128xf32>,
    } else {
    }
    %c0_i32_1 = arith.constant 0 : i32
    %5 = arith.cmpi eq, %1, %c0_i32_1 : i32
    %6 = arith.extui %5 : i1 to i32
    %c0_i32_2 = arith.constant 0 : i32
    %7 = arith.cmpi ne, %6, %c0_i32_2 : i32
    scf.if %7 {
      %cst = arith.constant 0.000000e+00 : f32
      %8 = vector.broadcast %cst : f32 to vector<1x8x128xf32>
      %c0 = arith.constant 0 : index
      %c0_3 = arith.constant 0 : index
      %c0_4 = arith.constant 0 : index
      %9 = vector.load %arg4[%c0, %c0_3, %c0_4] : memref<1x8x128xf32, #tpu.memory_space<vmem>>, vector<1x8x128xf32>
      tpu.vector_store %arg4[%c0, %c0_3, %c0_4], %8 {strides = array<i32>} : memref<1x8x128xf32, #tpu.memory_space<vmem>>, vector<1x8x128xf32>,
    } else {
    }
    return
  }
  func.func @transform_0(%arg0: i32, %arg1: i32, %arg2: memref<2xi32, #tpu.memory_space<smem>>) -> (i32, i32, i32) {
    %0 = arith.index_cast %arg0 : i32 to index
    %1 = memref.load %arg2[%0] : memref<2xi32, #tpu.memory_space<smem>>
    %c0_i32 = arith.constant 0 : i32
    %2 = arith.cmpi ne, %1, %c0_i32 : i32
    %c0_i32_0 = arith.constant 0 : i32
    %3 = arith.select %2, %arg1, %c0_i32_0 : i32
    %c0_i32_1 = arith.constant 0 : i32
    %c0_i32_2 = arith.constant 0 : i32
    return %arg0, %3, %c0_i32_1 : i32, i32, i32
  }
  func.func @transform_1(%arg0: i32, %arg1: i32, %arg2: memref<2xi32, #tpu.memory_space<smem>>) -> (i32, i32, i32) {
    %c0_i32 = arith.constant 0 : i32
    %c0_i32_0 = arith.constant 0 : i32
    return %arg0, %arg1, %c0_i32 : i32, i32, i32
  }
}

</mosaic_0001>

<bundles_post_ra>
// kernel: tpu_custom_call.1
= control target key start
LH: loop header
LB: loop body
LE: loop exit
PB: predicated region body
PF: predicated region fallthrough
CT: control target
= control target key end

     0   :  { %s677_s0 = inlined_call_operand.hbm [shape: s32[2], index: 0, kind: input, shape index: {}]   ;;  %s678_s1 = inlined_call_operand.hbm [shape: f32[2,8,128], index: 1, kind: input, shape index: {}]   ;;  %s679_s2 = inlined_call_operand.hbm [shape: f32[2,8,128], index: 2, kind: output, shape index: {}]  }
   0x1   :  { %s353_s11 = scalar_lea.hbm %s677_s0, 16 }
   0x2   :  { %p354_p0 = scmp.ne.s32.totalorder %s677_s0, %s353_s11  ;;  %p357_p1 = scmp.lt.u32.totalorder %s353_s11, %s677_s0 }
   0x4   :  { %p359_p2 = pnand %p357_p1, %p354_p0 }
   0x6   :  { %362 = shalt.err (!%p359_p2)  }
   0x7   :  { %s479_s16 = smov [#allocation3]  }
   0x8   :  { %8 = dma.hbm_to_smem %s677_s0, 16, %s479_s16, [#allocation2] }
   0x9   :  { %445 = dma.done.wait [#allocation2], 16 }
   0xa   :  { %446 = vsyncadd [#allocation2], 4294967280 }
   0xb   :  { %10 = sfence }
   0xc   :  { %11 = vsyncpa [#allocation5], 0 }
   0xd   :  { %13 = vsyncpa [#allocation5 + $0x1], 0 }
   0xe   :  { %14 = vsyncpa [#allocation6], 0 }
   0xf   :  { %16 = vsyncpa [#allocation6 + $0x1], 0  ;;  %s510_s19 = smov 0   ;;  %s512_s20 = smov 0  }
  0x10   :  { %s514_s21 = smov 0   ;;  %s516_s22 = smov 0  }
  0x11   :  { %s518_s23 = smov 0   ;;  %s520_s24 = smov 0  }
  0x12 LB: > { %s274_s0 = sadd.s32 4294967295, %s477_s24   ;;  %s275_s25 = sadd.s32 4294967294, %s477_s24   ;;  %s477_s24 = sphi %s520_s24, %s22_s24   ;;  %s473_s23 = sphi %s518_s23, %s695_s23   ;;  %s469_s22 = sphi %s516_s22, %s694_s22   ;;  %s465_s21 = sphi %s514_s21, %s693_s21   ;;  %s461_s20 = sphi %s512_s20, %s692_s20   ;;  %s457_s19 = sphi %s510_s19, %s691_s19  }
  0x13   : > { %s34_s26 = sadd.s32 1, %s473_s23  ;;  %s49_s27 = sadd.s32 1, %s465_s21 }
  0x14   : > { %p36_p3 = scmp.ge.s32.totalorder %s34_s26, 2  ;;  %p56_p4 = scmp.ne.s32.totalorder %s465_s21, %s461_s20 }
  0x15   : > { %p57_p5 = scmp.eq.s32.totalorder %s477_s24, 0  ;;  %p62_p6 = scmp.ne.s32.totalorder %s461_s20, %s457_s19 }
  0x16   : > { %s697_s26 = smov (%p36_p3, %s34_s26), 0  ;;  %p63_p8 = scmp.eq.s32.totalorder %s274_s0, 0 }
  0x17   : > { %p551_p7 = por %p57_p5, %p56_p4  ;;  %s44_s29 = ssub.s32 %s473_s23, %s697_s26 }
  0x18   : > { %p88_p9 = scmp.eq.s32.totalorder %s274_s0, 1  ;;  %p47_p10 = scmp.eq.s32.totalorder %s44_s29, 0 }
  0x19   : > { %p557_p11 = por %p63_p8, %p62_p6  ;;  %p94_p13 = scmp.eq.s32.totalorder %s275_s25, 1 }
  0x1a   : > { %p561_p12 = por %p88_p9, %p56_p4  ;;  %p301_p2 = scmp.lt.s32.totalorder %s477_s24, 2 }
  0x1b   : > { %s566_s4 = scalar_select %p47_p10, %s465_s21, %s49_s27  }
  0x1c   : > { %s683_s3 = scalar_select %p561_p12, 1, 0 }
  0x1d   : > { %p568_p0 = por %p94_p13, %p62_p6  ;;  %s114_s6 = sand.u32 1, %s465_s21  }
  0x1e   : > { %s278_s7 = sshll.u32 %s114_s6, 3  ;;  %s279_s8 = sshll.u32 %s473_s23, 7 }
  0x1f   : > { %s684_s5 = scalar_select %p568_p0, 1, 0 }
  0x20   : > { %s579_s11 = scalar_lea.hbm %s678_s1, %s279_s8  ;;  %s118_s12 = scalar_lea.vmem [#allocation4], %s278_s7 }
  0x21   : > { %s129_s13 = sshll.u32 %s118_s12, 4  ;;  %p585_p3 = pnand %p301_p2, %p551_p7  ;;  %s581_s13 = int_to_ptr.vmem [resolvable:$true] %s129_s13 }
  0x22   : > { %s115_s15 = scalar_lea.sflag [#allocation5], %s114_s6  ;;  %s363_s16 = scalar_lea.hbm %s579_s11, 128 }
  0x23   : > { %p364_p6 = scmp.ne.s32.totalorder %s579_s11, %s363_s16  ;;  %p365_p8 = pneg %p585_p3 }
  0x24   : > { %s368_s0 = scalar_lea.hbm %s678_s1, 256  ;;  %p369_p7 = scmp.lt.u32.totalorder %s579_s11, %s678_s1 }
  0x25   : > { %p366_p9 = pnand %p365_p8, %p364_p6  ;;  %p370_p13 = scmp.lt.u32.totalorder %s368_s0, %s363_s16 }
  0x26   : > { %p372_p1 = scmp.lt.u32.totalorder %s363_s16, %s579_s11 }
  0x27   : > { %p367_p10 = pneg %p366_p9  ;;  %p371_p2 = por %p370_p13, %p369_p7 }
  0x29   : > { %p373_p4 = por %p372_p1, %p371_p2 }
  0x2b   : > { %p374_p5 = pnand %p373_p4, %p367_p10 }
  0x2d   : > { %377 = shalt.err (!%p374_p5)
}
  0x2e   : > { %s378_s28 = scalar_lea.vmem %s581_s13, 128  ;;  %s480_s29 = smov [#allocation4]  }
  0x2f   : > { %p379_p6 = scmp.ne.s32.totalorder %s581_s13, %s378_s28  ;;  %s383_s6 = sshll.u32 %s480_s29, 4  ;;  %s384_s6 = int_to_ptr.vmem [resolvable:$false] %s383_s6 }
  0x30   : > { %s385_s7 = scalar_lea.vmem %s384_s6, 256  ;;  %p386_p12 = scmp.lt.s32.totalorder %s581_s13, %s384_s6 }
  0x31   : > { %p381_p9 = pnand %p379_p6, %p365_p8  ;;  %p387_p7 = scmp.lt.s32.totalorder %s385_s7, %s378_s28 }
  0x33   : > { %p382_p0 = pneg %p381_p9  ;;  %p388_p13 = por %p387_p7, %p386_p12 }
  0x35   : > { %p389_p1 = pnand %p388_p13, %p382_p0 }
  0x37   : > { %392 = shalt.err (!%p389_p1)
}
  0x38   : > { %296 = dma.hbm_to_vmem [thread:$0]  (!%p585_p3), %s579_s11, 128, %s581_s13, %s115_s15  }
  0x39   : > { %p686_p4 = scmp.lt.s32.totalorder %s477_s24, 3  ;;  %p687_p5 = scmp.ge.s32.totalorder %s477_s24, 1 }
  0x3b   : > { %p135_p8 = pnand %p687_p5, %p686_p4 }
  0x3c   : > { %s621_s8 = sand.u32 (!%p135_p8), 1, %s461_s20  }
  0x3d   : > { %138 = sbr.rel (%p135_p8) target bundleno = 118 (0x76), region = 24  ;;  %s281_s9 = sshll.u32 (!%p135_p8), %s621_s8, 3 }
  0x3e   : > { %s141_s10 = scalar_lea.sflag (!%p135_p8), [#allocation5], %s621_s8  ;;  %s144_s12 = scalar_lea.vmem (!%p135_p8), [#allocation4], %s281_s9 }
  0x44   : > { %448 = dma.done.wait (%p557_p11), %s141_s10, 128  }
  0x45   : > { %450 = vsyncadd (%p557_p11), %s141_s10, 4294967168  ;;  %s166_s11 = sld [smem:[#allocation3 + %s469_s22]]  ;;  %s162_s13 = scalar_lea.vmem [#allocation7], %s281_s9 }
  0x4b   : > { %p283_p12 = scmp.eq.s32.totalorder %s166_s11, 0 }
  0x4c   : > { %v171_v0 = vld [vmem:[%s144_s12] sm:$0xff] (!%p283_p12) }
  0x4d   : > { %170 = sbr.rel (%p283_p12) target bundleno = 84 (0x54), region = 32  ;;  %v172_v1 = vmul.f32 (!%p283_p12), 2.0, %v171_v0 }
  0x4f   : > { %173 = vst [vmem:[%s162_s13] sm:$0xff] (!%p283_p12), %v172_v1 }
  0x54 PF: > { %p284_p0 = scmp.ne.s32.totalorder %s166_s11, 0 }
  0x55   : > { %v481_v2 = vmov (!%p284_p0), 0.0  }
  0x56   : > { %177 = sbr.rel (%p284_p0) target bundleno = 93 (0x5d), region = 36  ;;  %178 = vst [vmem:[%s162_s13] sm:$0xff] (!%p284_p0), %v481_v2 }
  0x5d PF: > { %s286_s14 = sshll.u32 %s469_s22, 7  ;;  %s194_s17 = sshll.u32 %s162_s13, 4  ;;  %s195_s17 = int_to_ptr.vmem [resolvable:$true] %s194_s17 }
  0x5e   : > { %s634_s16 = scalar_lea.hbm %s679_s2, %s286_s14  ;;  %s180_s18 = scalar_lea.sflag [#allocation6], %s621_s8 }
  0x5f   : > { %s393_s0 = scalar_lea.vmem %s195_s17, 128  ;;  %p688_p3 = scmp.ne.s32.totalorder %s683_s3, 0 }
  0x60   : > { %p394_p11 = scmp.ne.s32.totalorder %s195_s17, %s393_s0  ;;  %s482_s25 = smov [#allocation7]  }
  0x61   : > { %s397_s27 = sshll.u32 %s482_s25, 4  ;;  %s398_s27 = int_to_ptr.vmem [resolvable:$false] %s397_s27 }
  0x62   : > { %p395_p10 = pnand %p394_p11, %p688_p3  ;;  %s399_s28 = scalar_lea.vmem %s398_s27, 256 }
  0x63   : > { %p400_p6 = scmp.lt.s32.totalorder %s195_s17, %s398_s27  ;;  %p401_p9 = scmp.lt.s32.totalorder %s399_s28, %s393_s0 }
  0x64   : > { %p396_p2 = pneg %p395_p10 }
  0x65   : > { %p402_p7 = por %p401_p9, %p400_p6 }
  0x67   : > { %p403_p13 = pnand %p402_p7, %p396_p2 }
  0x69   : > { %406 = shalt.err (!%p403_p13)
}
  0x6a   : > { %s407_s22 = scalar_lea.hbm %s634_s16, 128  ;;  %s411_s7 = scalar_lea.hbm %s679_s2, 256 }
  0x6b   : > { %p408_p1 = scmp.ne.s32.totalorder %s634_s16, %s407_s22  ;;  %p412_p8 = scmp.lt.u32.totalorder %s634_s16, %s679_s2 }
  0x6c   : > { %p413_p12 = scmp.lt.u32.totalorder %s411_s7, %s407_s22  ;;  %p415_p11 = scmp.lt.u32.totalorder %s407_s22, %s634_s16 }
  0x6d   : > { %p409_p4 = pnand %p408_p1, %p688_p3 }
  0x6e   : > { %p414_p0 = por %p413_p12, %p412_p8 }
  0x6f   : > { %p410_p5 = pneg %p409_p4 }
  0x70   : > { %p416_p10 = por %p415_p11, %p414_p0 }
  0x72   : > { %p417_p2 = pnand %p416_p10, %p410_p5 }
  0x74   : > { %420 = shalt.err (!%p417_p2)
}
  0x75   : > { %291 = dma.vmem_to_hbm [thread:$0]  (%p688_p3), %s195_s17, 128, %s634_s16, %s180_s18  }
  0x76 PF: > { %s206_s10 = sand.u32 1, %s457_s19   ;;  %p689_p6 = scmp.ne.s32.totalorder %s684_s5, 0 }
  0x77   : > { %p690_p9 = scmp.ge.s32.totalorder %s477_s24, 2  ;;  %s207_s12 = scalar_lea.sflag [#allocation6], %s206_s10 }
  0x79   : > { %p298_p7 = pnand %p690_p9, %p689_p6 }
  0x7b   : > { %452 = dma.done.wait (!%p298_p7), %s207_s12, 128  }
  0x7c   : > { %454 = vsyncadd (!%p298_p7), %s207_s12, 4294967168  ;;  %s22_s24 = sadd.s32 1, %s477_s24   ;;  %s691_s19 = smov %s461_s20 }
  0x7d   : > { %p19_p13 = scmp.ge.s32.totalorder %s22_s24, 4   ;;  %s692_s20 = smov %s465_s21 }
  0x7e   : > { %s693_s21 = smov %s566_s4  ;;  %s694_s22 = smov %s473_s23 }
  0x7f   : > { %s695_s23 = smov %s697_s26  ;;  %21 = sbr.rel (!%p19_p13) target bundleno = 18 (0x12), region = 77 }
  0x86   :  { %212 = vsyncpa [#allocation5], 1 }
  0x87   :  { %214 = vsyncpa [#allocation5 + $0x1], 1 }
  0x88   :  { %215 = vsyncpa [#allocation6], 1 }
  0x89   :  { %217 = vsyncpa [#allocation6 + $0x1], 1 }

</bundles_post_ra>
